<compile_context>
chip_gen: v7x
topology: tpu7x:2x2x1
jax: 0.10.0
libtpu: 0.0.40
codegen_flags: <defaults>
</compile_context>

<pallas_src>
import jax
import jax.numpy as jnp
from jax import lax
from jax.experimental import pallas as pl
from jax.experimental.pallas import tpu as pltpu

NUM_INPUTS = 4        # CartPole observation dim
NUM_ACTIONS = 2       # CartPole action dim
HIDDEN = 256          # hidden_size from the module
PAD_IN = 8            # input dim padded: 4 features + 1 constant-1 bias lane + 3 pad
TILE_B = 8            # batch rows per grid step (one sublane tile); raise for big rollouts
OUT_LANES = 8         # lane 0 = value, lanes 1..NUM_ACTIONS = policy, rest pad


def _actor_critic_kernel(x_ref, w1_ref, w2_ref, b2_ref, out_ref):
    # x:  (TILE_B, 8)        rows = padded states (real rows have 1.0 in the bias lane)
    # w1: (8, 2*HIDDEN)      fused [critic | actor] layer-1 weights (+ bias row)
    # w2: (2*HIDDEN, 8)      block-diagonal fused heads (narrow: no dead lanes)
    # b2: (1, 8)             packed head biases
    x = x_ref[...]

    # Fused hidden layer for both towers (layer-1 bias folded via the constant-1 lane).
    h = jnp.dot(x, w1_ref[...], preferred_element_type=jnp.float32)
    h = jnp.maximum(h, 0.0)                                   # ReLU

    # Fused heads: lane 0 = value, lanes 1..NUM_ACTIONS = actor logits.
    out = jnp.dot(h, w2_ref[...], preferred_element_type=jnp.float32) + b2_ref[...]

    # Masked, numerically-stable softmax over the logit lanes only.
    lane = lax.broadcasted_iota(jnp.int32, out.shape, 1)
    is_logit = (lane >= 1) & (lane < 1 + NUM_ACTIONS)
    masked = jnp.where(is_logit, out, jnp.float32(-jnp.inf))
    m = jnp.max(masked, axis=1, keepdims=True)                # finite: logit lanes always present
    e = jnp.where(is_logit, jnp.exp(masked - m), 0.0)
    denom = jnp.sum(e, axis=1, keepdims=True)
    policy = e / denom                                        # exact divide: keeps 1e-5 parity

    # Lane 0 keeps the value, lanes 1..A get the softmaxed policy, rest are raw (ignored).
    out_ref[...] = jnp.where(is_logit, policy, out)


@jax.jit
def actor_critic_forward_batched(states, packed_params):
    """states: (B, NUM_INPUTS) float array.
    Returns (values (B, 1), policies (B, NUM_ACTIONS))."""
    w1, w2, b2 = packed_params
    states = jnp.asarray(states, jnp.float32).reshape(-1, NUM_INPUTS)
    batch = states.shape[0]
    num_blocks = pl.cdiv(batch, TILE_B)
    b_pad = num_blocks * TILE_B

    # Pad the batch to a whole number of sublane tiles and fold the layer-1 bias
    # via a constant-1 lane.  Pad rows are all-zero (bias lane 0) -> harmless output rows.
    x = jnp.zeros((b_pad, PAD_IN), jnp.float32)
    x = x.at[:batch, :NUM_INPUTS].set(states)
    x = x.at[:batch, NUM_INPUTS].set(1.0)

    flops = 2 * b_pad * PAD_IN * (2 * HIDDEN) + 2 * b_pad * (2 * HIDDEN) * OUT_LANES
    bytes_accessed = 4 * (x.size + w1.size + w2.size + b2.size + b_pad * OUT_LANES)

    out = pl.pallas_call(
        _actor_critic_kernel,
        out_shape=jax.ShapeDtypeStruct((b_pad, OUT_LANES), jnp.float32),
        grid=(num_blocks,),
        in_specs=[
            pl.BlockSpec((TILE_B, PAD_IN), lambda i: (i, 0)),          # per-step state tile
            pl.BlockSpec((PAD_IN, 2 * HIDDEN), lambda i: (0, 0)),      # weights resident
            pl.BlockSpec((2 * HIDDEN, OUT_LANES), lambda i: (0, 0)),   # across grid steps
            pl.BlockSpec((1, OUT_LANES), lambda i: (0, 0)),
        ],
        out_specs=pl.BlockSpec((TILE_B, OUT_LANES), lambda i: (i, 0)),
        compiler_params=pltpu.CompilerParams(
            dimension_semantics=("parallel",),                         # shard batch over TCs
        ),
        cost_estimate=pl.CostEstimate(
            flops=flops,
            transcendentals=b_pad * NUM_ACTIONS,
            bytes_accessed=bytes_accessed,
        ),
    )(x, w1, w2, b2)

    values = out[:batch, 0:1]                                 # (B, 1)
    policies = out[:batch, 1:1 + NUM_ACTIONS]                 # (B, NUM_ACTIONS)
    return values, policies


def actor_critic_forward(state, packed_params):
    """Single-state convenience path matching the PyTorch module's forward signature.
    state: (num_inputs,).  Returns (value (1, 1), policy (1, num_actions))."""
    s = jnp.asarray(state, jnp.float32).reshape(1, NUM_INPUTS)
    return actor_critic_forward_batched(s, packed_params)


def init_params(key, num_inputs=NUM_INPUTS, num_actions=NUM_ACTIONS, hidden=HIDDEN):
    """Deterministic init mimicking nn.Linear default: U(-1/sqrt(fan_in), 1/sqrt(fan_in)).
    Weights stored transposed: (in_features, out_features)."""
    ks = jax.random.split(key, 8)

    def lin(kw, kb, fan_in, fan_out):
        bound = 1.0 / jnp.sqrt(jnp.float32(fan_in))
        w = jax.random.uniform(kw, (fan_in, fan_out), jnp.float32, -bound, bound)
        b = jax.random.uniform(kb, (1, fan_out), jnp.float32, -bound, bound)
        return w, b

    w1c, b1c = lin(ks[0], ks[1], num_inputs, hidden)
    w2c, b2c = lin(ks[2], ks[3], hidden, 1)
    w1a, b1a = lin(ks[4], ks[5], num_inputs, hidden)
    w2a, b2a = lin(ks[6], ks[7], hidden, num_actions)
    return (w1c, b1c, w2c, b2c, w1a, b1a, w2a, b2a)


def pack_params(params, num_inputs=NUM_INPUTS, num_actions=NUM_ACTIONS, hidden=HIDDEN):
    """Fuse the 8 per-layer tensors into 3 compact kernel operands (no dead 128-lane padding)."""
    w1c, b1c, w2c, b2c, w1a, b1a, w2a, b2a = params

    # W1: (PAD_IN, 2*HIDDEN). Rows 0..num_inputs-1 = weights, row num_inputs = biases.
    w1 = jnp.zeros((PAD_IN, 2 * hidden), jnp.float32)
    w1 = w1.at[:num_inputs, :hidden].set(w1c)
    w1 = w1.at[:num_inputs, hidden:].set(w1a)
    w1 = w1.at[num_inputs, :hidden].set(b1c[0])
    w1 = w1.at[num_inputs, hidden:].set(b1a[0])

    # W2: (2*HIDDEN, OUT_LANES), block-diagonal so the heads don't mix.
    w2 = jnp.zeros((2 * hidden, OUT_LANES), jnp.float32)
    w2 = w2.at[:hidden, 0].set(w2c[:, 0])                     # critic -> lane 0
    w2 = w2.at[hidden:, 1:1 + num_actions].set(w2a)           # actor  -> lanes 1..A

    # b2: (1, OUT_LANES) packed head biases.
    b2 = jnp.zeros((1, OUT_LANES), jnp.float32)
    b2 = b2.at[0, 0].set(b2c[0, 0])
    b2 = b2.at[0, 1:1 + num_actions].set(b2a[0])

    return (w1, w2, b2)


def reference_forward(states, params):
    """Pure-JAX reference for correctness checking (mirrors the PyTorch module, batched)."""
    w1c, b1c, w2c, b2c, w1a, b1a, w2a, b2a = params
    x = jnp.asarray(states, jnp.float32).reshape(-1, NUM_INPUTS)
    v = jnp.maximum(x @ w1c + b1c, 0.0) @ w2c + b2c
    h = jnp.maximum(x @ w1a + b1a, 0.0)
    logits = h @ w2a + b2a
    p = jax.nn.softmax(logits, axis=1)
    return v, p


if __name__ == "__main__":
    key = jax.random.PRNGKey(0)
    k_state, k_params = jax.random.split(key)

    batch = 16                                   # 2 grid steps of TILE_B=8 rows each
    states = jax.random.normal(k_state, (batch, NUM_INPUTS), jnp.float32)
    params = init_params(k_params)
    packed = pack_params(params)

    values, policies = actor_critic_forward_batched(states, packed)
    jax.block_until_ready((values, policies))

    v_ref, p_ref = reference_forward(states, params)
    assert values.shape == (batch, 1) and policies.shape == (batch, NUM_ACTIONS)
    assert jnp.allclose(values, v_ref, atol=1e-5, rtol=1e-5), (values, v_ref)
    assert jnp.allclose(policies, p_ref, atol=1e-5, rtol=1e-5), (policies, p_ref)
    assert jnp.allclose(jnp.sum(policies, axis=1), 1.0, atol=1e-5)

    # Single-state path matching the PyTorch module's per-step forward.
    value1, policy1 = actor_critic_forward(states[0], packed)
    jax.block_until_ready((value1, policy1))
    assert value1.shape == (1, 1) and policy1.shape == (1, NUM_ACTIONS)
    assert jnp.allclose(value1, v_ref[0:1], atol=1e-5, rtol=1e-5)
    assert jnp.allclose(policy1, p_ref[0:1], atol=1e-5, rtol=1e-5)

    print("KERNEL_OK")
</pallas_src>

<mosaic_0001>
module attributes {stable_mosaic.version = 11 : i64} {
  func.func @_actor_critic_kernel(%arg0: i32, %arg1: memref<8x8xf32, #tpu.memory_space<vmem>>, %arg2: memref<8x512xf32, #tpu.memory_space<vmem>>, %arg3: memref<512x8xf32, #tpu.memory_space<vmem>>, %arg4: memref<1x8xf32, #tpu.memory_space<vmem>>, %arg5: memref<8x8xf32, #tpu.memory_space<vmem>>) attributes {dimension_semantics = [#tpu.dimension_semantics<parallel>], iteration_bounds = array<i64: 2>, scalar_prefetch = 0 : i64, scratch_operands = 0 : i64, tpu.core_type = #tpu.core_type<tc>, window_params = [{transform_indices = @transform_0, window_bounds = array<i64: 8, 8>}, {pipeline_mode = #tpu.pipeline_mode<synchronous>, transform_indices = @transform_1, window_bounds = array<i64: 8, 512>}, {pipeline_mode = #tpu.pipeline_mode<synchronous>, transform_indices = @transform_2, window_bounds = array<i64: 512, 8>}, {pipeline_mode = #tpu.pipeline_mode<synchronous>, transform_indices = @transform_3, window_bounds = array<i64: 1, 8>}, {transform_indices = @transform_4, window_bounds = array<i64: 8, 8>}]} {
    %c0 = arith.constant 0 : index
    %c0_0 = arith.constant 0 : index
    %0 = vector.load %arg1[%c0, %c0_0] : memref<8x8xf32, #tpu.memory_space<vmem>>, vector<8x8xf32>
    %c0_1 = arith.constant 0 : index
    %c0_2 = arith.constant 0 : index
    %1 = vector.load %arg2[%c0_1, %c0_2] : memref<8x512xf32, #tpu.memory_space<vmem>>, vector<8x512xf32>
    %cst = arith.constant dense<0.000000e+00> : vector<8x512xf32>
    %2 = tpu.matmul %0, %1, %cst {dimension_numbers = #tpu.dot_dimension_numbers<[1], [0], [0], [1], [0, 0, 1, 1], [], []>} : vector<8x8xf32>, vector<8x512xf32>, vector<8x512xf32> -> vector<8x512xf32>
    %cst_3 = arith.constant 0.000000e+00 : f32
    %3 = vector.broadcast %cst_3 : f32 to vector<8x512xf32>
    %4 = arith.maximumf %2, %3 : vector<8x512xf32>
    %c0_4 = arith.constant 0 : index
    %c0_5 = arith.constant 0 : index
    %5 = vector.load %arg3[%c0_4, %c0_5] : memref<512x8xf32, #tpu.memory_space<vmem>>, vector<512x8xf32>
    %cst_6 = arith.constant dense<0.000000e+00> : vector<8x8xf32>
    %6 = tpu.matmul %4, %5, %cst_6 {dimension_numbers = #tpu.dot_dimension_numbers<[1], [0], [0], [1], [0, 0, 1, 1], [], []>} : vector<8x512xf32>, vector<512x8xf32>, vector<8x8xf32> -> vector<8x8xf32>
    %c0_7 = arith.constant 0 : index
    %c0_8 = arith.constant 0 : index
    %7 = vector.load %arg4[%c0_7, %c0_8] : memref<1x8xf32, #tpu.memory_space<vmem>>, vector<1x8xf32>
    %8 = vector.broadcast %7 : vector<1x8xf32> to vector<8x8xf32>
    %9 = arith.addf %6, %8 : vector<8x8xf32>
    %10 = tpu.iota {dimensions = array<i32: 1>} : vector<8x8xi32>
    %c1_i32 = arith.constant 1 : i32
    %11 = vector.broadcast %c1_i32 : i32 to vector<8x8xi32>
    %12 = arith.cmpi sge, %10, %11 : vector<8x8xi32>
    %c3_i32 = arith.constant 3 : i32
    %13 = vector.broadcast %c3_i32 : i32 to vector<8x8xi32>
    %14 = arith.cmpi slt, %10, %13 : vector<8x8xi32>
    %15 = arith.andi %12, %14 : vector<8x8xi1>
    %cst_9 = arith.constant 0xFF800000 : f32
    %16 = vector.broadcast %cst_9 : f32 to vector<8x8xf32>
    %17 = arith.select %15, %9, %16 : vector<8x8xi1>, vector<8x8xf32>
    %cst_10 = arith.constant dense<0xFF800000> : vector<8xf32>
    %18 = vector.multi_reduction <maximumf>, %17, %cst_10 [1] : vector<8x8xf32> to vector<8xf32>
    %19 = vector.shape_cast %18 : vector<8xf32> to vector<8x1xf32>
    %20 = vector.broadcast %19 : vector<8x1xf32> to vector<8x8xf32>
    %21 = arith.subf %17, %20 : vector<8x8xf32>
    %22 = math.exp %21 : vector<8x8xf32>
    %cst_11 = arith.constant 0.000000e+00 : f32
    %23 = vector.broadcast %cst_11 : f32 to vector<8x8xf32>
    %24 = arith.select %15, %22, %23 : vector<8x8xi1>, vector<8x8xf32>
    %cst_12 = arith.constant dense<0.000000e+00> : vector<8xf32>
    %25 = vector.multi_reduction <add>, %24, %cst_12 [1] : vector<8x8xf32> to vector<8xf32>
    %26 = vector.shape_cast %25 : vector<8xf32> to vector<8x1xf32>
    %27 = vector.broadcast %26 : vector<8x1xf32> to vector<8x8xf32>
    %28 = arith.divf %24, %27 : vector<8x8xf32>
    %29 = arith.select %15, %28, %9 : vector<8x8xi1>, vector<8x8xf32>
    %c0_13 = arith.constant 0 : index
    %c0_14 = arith.constant 0 : index
    %30 = vector.load %arg5[%c0_13, %c0_14] : memref<8x8xf32, #tpu.memory_space<vmem>>, vector<8x8xf32>
    tpu.vector_store %arg5[%c0_13, %c0_14], %29 {strides = array<i32>} : memref<8x8xf32, #tpu.memory_space<vmem>>, vector<8x8xf32>,
    return
  }
  func.func @transform_0(%arg0: i32) -> (i32, i32) {
    %c0_i32 = arith.constant 0 : i32
    %c0_i32_0 = arith.constant 0 : i32
    return %arg0, %c0_i32 : i32, i32
  }
  func.func @transform_1(%arg0: i32) -> (i32, i32) {
    %c0_i32 = arith.constant 0 : i32
    %c0_i32_0 = arith.constant 0 : i32
    %c0_i32_1 = arith.constant 0 : i32
    return %c0_i32, %c0_i32_0 : i32, i32
  }
  func.func @transform_2(%arg0: i32) -> (i32, i32) {
    %c0_i32 = arith.constant 0 : i32
    %c0_i32_0 = arith.constant 0 : i32
    %c0_i32_1 = arith.constant 0 : i32
    return %c0_i32, %c0_i32_0 : i32, i32
  }
  func.func @transform_3(%arg0: i32) -> (i32, i32) {
    %c0_i32 = arith.constant 0 : i32
    %c0_i32_0 = arith.constant 0 : i32
    %c0_i32_1 = arith.constant 0 : i32
    return %c0_i32, %c0_i32_0 : i32, i32
  }
  func.func @transform_4(%arg0: i32) -> (i32, i32) {
    %c0_i32 = arith.constant 0 : i32
    %c0_i32_0 = arith.constant 0 : i32
    return %arg0, %c0_i32 : i32, i32
  }
}

</mosaic_0001>

<bundles_post_ra>
// kernel: actor_critic_forward_batched.1
= control target key start
LH: loop header
LB: loop body
LE: loop exit
PB: predicated region body
PF: predicated region fallthrough
CT: control target
= control target key end

     0   :  { %s825_s15 = smov 0   ;;  %s1071_s0 = inlined_call_operand.vmem [shape: f32[16,8], index: 0, kind: input, shape index: {}]   ;;  %s1072_s1 = inlined_call_operand.vmem [shape: f32[8,512], index: 1, kind: input, shape index: {}]   ;;  %s1073_s2 = inlined_call_operand.vmem [shape: f32[512,8], index: 2, kind: input, shape index: {}]   ;;  %s1074_s3 = inlined_call_operand.vmem [shape: f32[1,8], index: 3, kind: input, shape index: {}]   ;;  %s1075_s4 = inlined_call_operand.vmem [shape: f32[16,8], index: 4, kind: output, shape index: {}]  }
   0x1 LB: > { %s632_s16 = sadd.s32 4294967295, %s797_s15   ;;  %p636_p0 = scmp.ge.s32.totalorder %s797_s15, 1  ;;  %s797_s15 = sphi %s825_s15, %s14_s15  }
   0x2   : > { %p161_p1 = scmp.lt.s32.totalorder %s797_s15, 3 }
   0x4   : > { %p162_p2 = pnand %p636_p0, %p161_p1 }
   0x5   : > { %v195_v0 = vld [vmem:[%s1072_s1 + $0x8] sm:$0xff] (!%p162_p2)  ;;  %v197_v1 = vld [vmem:[%s1072_s1 + $0x18] sm:$0xff] (!%p162_p2)  ;;  %v194_v2 = vld [vmem:[%s1072_s1] sm:$0xff] (!%p162_p2)  ;;  %p185_p3 = scmp.lt.s32.totalorder (!%p162_p2), %s632_s16, 1  ;;  %v799_v6 = vmov (!%p162_p2), 0.0   ;;  %vm198_vm0 = vcmask (!%p162_p2), 64512  }
   0x6   : > { %165 = sbr.rel (%p162_p2) target bundleno = 770 (0x302), region = 36  ;;  %202 = vmatprep.subr.mxu0 (!%p162_p2), %v195_v0  ;;  %273 = vmatprep.subr.mxu1 (!%p162_p2), %v197_v1  ;;  %v196_v3 = vld [vmem:[%s1072_s1 + $0x10] sm:$0xff] (!%p162_p2)  ;;  %v364_v4 = vld [vmem:[%s1073_s2 + $0x80] sm:$0xff] (!%p162_p2)  ;;  %v365_v5 = vld [vmem:[%s1073_s2 + $0x88] sm:$0xff] (!%p162_p2) }
   0x7   : > { %203 = vmatpush1.msra.mxu0 (!%p162_p2), %v194_v2  ;;  %266 = vmatprep.mubr.f32.mxu0 (!%p162_p2), %v799_v6  ;;  %v714_v7 = vpack.c.bf16 (!%p162_p2), %v365_v5, %v364_v4  ;;  %v396_v8 = vld [vmem:[%s1073_s2 + $0x180] sm:$0xff] (!%p162_p2)  ;;  %v397_v9 = vld [vmem:[%s1073_s2 + $0x188] sm:$0xff] (!%p162_p2)  ;;  %v366_v17 = vld [vmem:[%s1073_s2 + $0x90] sm:$0xff] (!%p162_p2) }
   0x8   : > { %v348_v10 = vld [vmem:[%s1073_s2] sm:$0xff] (!%p162_p2)  ;;  %274 = vmatpush1.msra.mxu1 (!%p162_p2), %v196_v3  ;;  %337 = vmatprep.mubr.f32.mxu1 (!%p162_p2), %v799_v6  ;;  %v746_v11 = vpack.c.bf16 (!%p162_p2), %v397_v9, %v396_v8  ;;  %v349_v12 = vld [vmem:[%s1073_s2 + $0x8] sm:$0xff] (!%p162_p2)  ;;  %v367_v18 = vld [vmem:[%s1073_s2 + $0x98] sm:$0xff] (!%p162_p2) }
   0x9   : > { %v380_v13 = vld [vmem:[%s1073_s2 + $0x100] sm:$0xff] (!%p162_p2)  ;;  %v381_v14 = vld [vmem:[%s1073_s2 + $0x108] sm:$0xff] (!%p162_p2)  ;;  %715 = vmatprep.subr.bf16.mxu0 (!%p162_p2), %v714_v7  ;;  %v716_v15 = vpack.c.bf16 (!%p162_p2), %v349_v12, %v348_v10  ;;  %v398_v19 = vld [vmem:[%s1073_s2 + $0x190] sm:$0xff] (!%p162_p2)  ;;  %v718_v20 = vpack.c.bf16 (!%p162_p2), %v367_v18, %v366_v17 }
   0xa   : > { %v748_v16 = vpack.c.bf16 (!%p162_p2), %v381_v14, %v380_v13  ;;  %747 = vmatprep.subr.bf16.mxu1 (!%p162_p2), %v746_v11  ;;  %v399_v21 = vld [vmem:[%s1073_s2 + $0x198] sm:$0xff] (!%p162_p2)  ;;  %v350_v22 = vld [vmem:[%s1073_s2 + $0x10] sm:$0xff] (!%p162_p2)  ;;  %v368_v28 = vld [vmem:[%s1073_s2 + $0xa0] sm:$0xff] (!%p162_p2) }
   0xb   : > { %v351_v23 = vld [vmem:[%s1073_s2 + $0x18] sm:$0xff] (!%p162_p2)  ;;  %v750_v25 = vpack.c.bf16 (!%p162_p2), %v399_v21, %v398_v19  ;;  %v382_v26 = vld [vmem:[%s1073_s2 + $0x110] sm:$0xff] (!%p162_p2)  ;;  %v369_v29 = vld [vmem:[%s1073_s2 + $0xa8] sm:$0xff] (!%p162_p2) }
   0xc   : > { %v383_v27 = vld [vmem:[%s1073_s2 + $0x118] sm:$0xff] (!%p162_p2)  ;;  %v400_v30 = vld [vmem:[%s1073_s2 + $0x1a0] sm:$0xff] (!%p162_p2)  ;;  %v720_v31 = vpack.c.bf16 (!%p162_p2), %v351_v23, %v350_v22  ;;  %v401_v33 = vld [vmem:[%s1073_s2 + $0x1a8] sm:$0xff] (!%p162_p2)  ;;  %v722_v36 = vpack.c.bf16 (!%p162_p2), %v369_v29, %v368_v28 }
   0xd   : > { %s1079_s16 = smov (!%p185_p3, %s632_s16), 1  ;;  %v752_v32 = vpack.c.bf16 %v383_v27, %v382_v26  ;;  %v352_v34 = vld [vmem:[%s1073_s2 + $0x20] sm:$0xff]  ;;  %v353_v35 = vld [vmem:[%s1073_s2 + $0x28] sm:$0xff]  ;;  %v754_v37 = vpack.c.bf16 %v401_v33, %v400_v30  ;;  %v370_v40 = vld [vmem:[%s1073_s2 + $0xb0] sm:$0xff] }
   0xe   : > { %s637_s17 = sshll.u32 %s1079_s16, 3  ;;  %v384_v38 = vld [vmem:[%s1073_s2 + $0x120] sm:$0xff]  ;;  %v385_v39 = vld [vmem:[%s1073_s2 + $0x128] sm:$0xff]  ;;  %v371_v41 = vld [vmem:[%s1073_s2 + $0xb8] sm:$0xff]  ;;  %v724_v44 = vpack.c.bf16 %v353_v35, %v352_v34 }
   0xf   : > { %s188_s26 = scalar_lea.vmem %s1071_s0, %s637_s17  ;;  %v402_v42 = vld [vmem:[%s1073_s2 + $0x1b0] sm:$0xff]  ;;  %v403_v43 = vld [vmem:[%s1073_s2 + $0x1b8] sm:$0xff]  ;;  %v756_v45 = vpack.c.bf16 %v385_v39, %v384_v38  ;;  %v726_v48 = vpack.c.bf16 %v371_v41, %v370_v40  ;;  %v372_v52 = vld [vmem:[%s1073_s2 + $0xc0] sm:$0xff]  ;;  %s192_s22 = scalar_lea.vmem %s1075_s4, %s637_s17 }
  0x10   : > { %v193_v24 = vld [vmem:[%s188_s26] sm:$0xff]  ;;  %v354_v46 = vld [vmem:[%s1073_s2 + $0x30] sm:$0xff]  ;;  %v355_v47 = vld [vmem:[%s1073_s2 + $0x38] sm:$0xff]  ;;  %v758_v49 = vpack.c.bf16 %v403_v43, %v402_v42 }
  0x11   : > { %639 = vmatmul.mubr.msk.f32.vlgmr.msra.gmra.mrb[0].mxu0 %vm198_vm0, %v193_v24  ;;  %640 = vmatmul.mubr.msk.f32.vlgmr.msra.gmra.mrb[0].mxu1 %vm198_vm0, %v193_v24  ;;  %v386_v50 = vld [vmem:[%s1073_s2 + $0x130] sm:$0xff]  ;;  %v387_v51 = vld [vmem:[%s1073_s2 + $0x138] sm:$0xff]  ;;  %v373_v53 = vld [vmem:[%s1073_s2 + $0xc8] sm:$0xff]  ;;  %v728_v56 = vpack.c.bf16 %v355_v47, %v354_v46  ;;  %v559_v46 = vlaneseq }
  0x12   : > { %717 = vmatpush3.bf16.msra.mxu0 %v716_v15  ;;  %749 = vmatpush3.bf16.msra.mxu1 %v748_v16  ;;  %v404_v54 = vld [vmem:[%s1073_s2 + $0x1c0] sm:$0xff]  ;;  %v405_v55 = vld [vmem:[%s1073_s2 + $0x1c8] sm:$0xff]  ;;  %v760_v57 = vpack.c.bf16 %v387_v51, %v386_v50  ;;  %v730_v60 = vpack.c.bf16 %v373_v53, %v372_v52  ;;  %v374_v0 = vld [vmem:[%s1073_s2 + $0xd0] sm:$0xff] }
  0x13   : > { %719 = vmatprep.subr.bf16.mxu0 %v718_v20  ;;  %751 = vmatprep.subr.bf16.mxu1 %v750_v25  ;;  %v356_v58 = vld [vmem:[%s1073_s2 + $0x40] sm:$0xff]  ;;  %v357_v59 = vld [vmem:[%s1073_s2 + $0x48] sm:$0xff]  ;;  %v762_v61 = vpack.c.bf16 %v405_v55, %v404_v54  ;;  %v375_v1 = vld [vmem:[%s1073_s2 + $0xd8] sm:$0xff]  ;;  %v560_v47 = vand.u32 127, %v559_v46 }
  0x14   : > { %v388_v62 = vld [vmem:[%s1073_s2 + $0x140] sm:$0xff]  ;;  %v389_v63 = vld [vmem:[%s1073_s2 + $0x148] sm:$0xff]  ;;  %v406_v2 = vld [vmem:[%s1073_s2 + $0x1d0] sm:$0xff]  ;;  %v732_v4 = vpack.c.bf16 %v357_v59, %v356_v58  ;;  %v734_v8 = vpack.c.bf16 %v375_v1, %v374_v0 }
  0x15   : > { %v407_v3 = vld [vmem:[%s1073_s2 + $0x1d8] sm:$0xff]  ;;  %v764_v5 = vpack.c.bf16 %v389_v63, %v388_v62  ;;  %v358_v6 = vld [vmem:[%s1073_s2 + $0x50] sm:$0xff]  ;;  %v376_v12 = vld [vmem:[%s1073_s2 + $0xe0] sm:$0xff]  ;;  %vm561_vm1 = vcmp.ge.s32.totalorder %v560_v47, 1  ;;  %vm562_vm2 = vcmp.lt.s32.totalorder %v560_v47, 3 }
  0x16   : > { %721 = vmatpush3.bf16.msra.mxu0 %v720_v31  ;;  %753 = vmatpush3.bf16.msra.mxu1 %v752_v32  ;;  %v359_v7 = vld [vmem:[%s1073_s2 + $0x58] sm:$0xff]  ;;  %v766_v9 = vpack.c.bf16 %v407_v3, %v406_v2  ;;  %v390_v10 = vld [vmem:[%s1073_s2 + $0x150] sm:$0xff]  ;;  %v377_v13 = vld [vmem:[%s1073_s2 + $0xe8] sm:$0xff] }
  0x17   : > { %723 = vmatprep.subr.bf16.mxu0 %v722_v36  ;;  %755 = vmatprep.subr.bf16.mxu1 %v754_v37  ;;  %v391_v11 = vld [vmem:[%s1073_s2 + $0x158] sm:$0xff]  ;;  %v408_v14 = vld [vmem:[%s1073_s2 + $0x1e0] sm:$0xff]  ;;  %v409_v15 = vld [vmem:[%s1073_s2 + $0x1e8] sm:$0xff]  ;;  %v736_v16 = vpack.c.bf16 %v359_v7, %v358_v6  ;;  %v738_v19 = vpack.c.bf16 %v377_v13, %v376_v12 }
  0x18   : > { %v768_v17 = vpack.c.bf16 %v391_v11, %v390_v10  ;;  %v360_v18 = vld [vmem:[%s1073_s2 + $0x60] sm:$0xff]  ;;  %v770_v20 = vpack.c.bf16 %v409_v15, %v408_v14  ;;  %v361_v21 = vld [vmem:[%s1073_s2 + $0x68] sm:$0xff]  ;;  %v378_v26 = vld [vmem:[%s1073_s2 + $0xf0] sm:$0xff] }
  0x19   : > { %v392_v22 = vld [vmem:[%s1073_s2 + $0x160] sm:$0xff]  ;;  %v393_v23 = vld [vmem:[%s1073_s2 + $0x168] sm:$0xff]  ;;  %v740_v24 = vpack.c.bf16 %v361_v21, %v360_v18  ;;  %v379_v27 = vld [vmem:[%s1073_s2 + $0xf8] sm:$0xff] }
  0x1a   : > { %725 = vmatpush3.bf16.msra.mxu0 %v724_v44  ;;  %757 = vmatpush3.bf16.msra.mxu1 %v756_v45  ;;  %v772_v25 = vpack.c.bf16 %v393_v23, %v392_v22  ;;  %v410_v28 = vld [vmem:[%s1073_s2 + $0x1f0] sm:$0xff]  ;;  %v742_v29 = vpack.c.bf16 %v379_v27, %v378_v26  ;;  %v411_v30 = vld [vmem:[%s1073_s2 + $0x1f8] sm:$0xff]  ;;  %v641_v50 = vld [vmem:[%s1074_s3] ss:$0 sm:$0xff] }
  0x1b   : > { %727 = vmatprep.subr.bf16.mxu0 %v726_v48  ;;  %759 = vmatprep.subr.bf16.mxu1 %v758_v49  ;;  %v362_v31 = vld [vmem:[%s1073_s2 + $0x70] sm:$0xff]  ;;  %v363_v32 = vld [vmem:[%s1073_s2 + $0x78] sm:$0xff]  ;;  %v774_v33 = vpack.c.bf16 %v411_v30, %v410_v28  ;;  %vm1050_vm3 = vmand %vm561_vm1, %vm562_vm2 }
  0x1c   : > { %v744_v34 = vpack.c.bf16 %v363_v32, %v362_v31  ;;  %v394_v35 = vld [vmem:[%s1073_s2 + $0x170] sm:$0xff]  ;;  %v395_v36 = vld [vmem:[%s1073_s2 + $0x178] sm:$0xff] }
  0x1d   : > { %v776_v37 = vpack.c.bf16 %v395_v36, %v394_v35 }
  0x1e   : > { %729 = vmatpush3.bf16.msra.mxu0 %v728_v56  ;;  %761 = vmatpush3.bf16.msra.mxu1 %v760_v57 }
  0x1f   : > { %731 = vmatprep.subr.bf16.mxu0 %v730_v60  ;;  %763 = vmatprep.subr.bf16.mxu1 %v762_v61 }
  0x22   : > { %733 = vmatpush3.bf16.msra.mxu0 %v732_v4  ;;  %765 = vmatpush3.bf16.msra.mxu1 %v764_v5 }
  0x23   : > { %735 = vmatprep.subr.bf16.mxu0 %v734_v8  ;;  %767 = vmatprep.subr.bf16.mxu1 %v766_v9 }
  0x26   : > { %737 = vmatpush3.bf16.msra.mxu0 %v736_v16  ;;  %769 = vmatpush3.bf16.msra.mxu1 %v768_v17 }
  0x27   : > { %739 = vmatprep.subr.bf16.mxu0 %v738_v19  ;;  %771 = vmatprep.subr.bf16.mxu1 %v770_v20 }
  0x2a   : > { %741 = vmatpush3.bf16.msra.mxu0 %v740_v24  ;;  %773 = vmatpush3.bf16.msra.mxu1 %v772_v25 }
  0x2b   : > { %743 = vmatprep.subr.bf16.mxu0 %v742_v29  ;;  %775 = vmatprep.subr.bf16.mxu1 %v774_v33 }
  0x2e   : > { %745 = vmatpush3.bf16.msra.mxu0 %v744_v34  ;;  %777 = vmatpush3.bf16.msra.mxu1 %v776_v37 }
  0xe4   : > { %v268_v38 = vpop.f32.mrb[0].mxu0  ;;  %v339_v39 = vpop.f32.mrb[0].mxu1 }
  0xe5   : > { %v346_v40 = vmax.f32 %v339_v39, 0.0  ;;  %v270_v41 = vpop.f32.mrb[1].mxu0  ;;  %v341_v42 = vpop.f32.mrb[1].mxu1  ;;  %v344_v45 = vmax.f32 %v268_v38, 0.0 }
  0xe6   : > { %v345_v43 = vmax.f32 %v270_v41, 0.0  ;;  %v347_v44 = vmax.f32 %v341_v42, 0.0 }
  0xe8   : > { %483 = vmatprep.mubr.f32.mxu0 %v345_v43  ;;  %553 = vmatprep.mubr.f32.mxu1 %v347_v44 }
  0xe9   : > { %484 = vmatmul.mubr.f32.vlgmr.msra.gmra.mrb[2].mxu0 %v344_v45  ;;  %554 = vmatmul.mubr.f32.vlgmr.msra.gmra.mrb[2].mxu1 %v346_v40 }
 0x1bc   : > { %v676_v48 = vpop.f32.mrb[2].mxu0  ;;  %v711_v49 = vpop.f32.mrb[2].mxu1 }
 0x1bd   : > { %v677_v51 = vpop.f32.mrb[3].mxu0  ;;  %v712_v52 = vpop.f32.mrb[3].mxu1 }
 0x1be   : > { %v678_v53 = vadd.f32 %v677_v51, %v676_v48  ;;  %v713_v54 = vadd.f32 %v712_v52, %v711_v49 }
 0x1c0   : > { %v486_v55 = vadd.f32 %v678_v53, %v641_v50 }
 0x1c2   : > { %v556_v57 = vadd.f32 %v713_v54, %v486_v55 }
 0x1c4   : > { %v564_v58 = vsel %vm1050_vm3, %v556_v57, -inf }
 0x1c5   : > { %v565_v59 = vsel %vm198_vm0, %v564_v58, -inf }
 0x1c6   : > { %566 = vmax.xlane.f32.xlu0 %v565_v59 }
 0x253   : > { %v567_v60 = vpop.xlane.xlu0 %566 }
 0x254   : > { %v568_v61 = vsub.f32 %v564_v58, %v567_v60 }
 0x256   : > { %v569_v62 = vmul.f32 1.442695, %v568_v61 }
 0x258   : > { %787 = vpow2.f32 %v569_v62 }
 0x262   : > { %v788_v63 = vpop.eup %787 }
 0x263   : > { %v571_v0 = vsel %vm1050_vm3, %v788_v63, 0.0 }
 0x264   : > { %v572_v1 = vsel %vm198_vm0, %v571_v0, 0.0 }
 0x265   : > { %573 = vadd.xlane.f32.xlu0 %v572_v1 }
 0x2f2   : > { %v574_v2 = vpop.xlane.xlu0 %573 }
 0x2f3   : > { %789 = vrcp.f32 %v574_v2 }
 0x2fd   : > { %v790_v3 = vpop.eup %789 }
 0x2fe   : > { %v576_v4 = vmul.f32 %v790_v3, %v571_v0 }
 0x300   : > { %v577_v5 = vsel %vm1050_vm3, %v576_v4, %v556_v57 }
 0x301   : > { %578 = vst.msk [vmem:[%s192_s22] sm:$0xff] %vm198_vm0, %v577_v5 }
 0x302 PF: > { %s14_s15 = sadd.s32 1, %s797_s15  }
 0x303   : > { %p11_p4 = scmp.ge.s32.totalorder %s14_s15, 4  }
 0x305   :  { %13 = sbr.rel (!%p11_p4) target bundleno = 1 (0x1), region = 66 }

</bundles_post_ra>
